<compile_context>
chip_gen: v5e
topology: v5e:2x2
jax: 0.10.0
libtpu: 0.0.40
codegen_flags: <defaults>
</compile_context>

<pallas_src>
import numpy as np
import jax
import jax.numpy as jnp
from jax.experimental import pallas as pl
from jax.experimental.pallas import tpu as pltpu

BOARD_W = 8
BOARD_H = 8
CHANNEL_NUM = 3
FEAT_DIM = 92 * CHANNEL_NUM          # 276 true myconv features
IN_DIM = 2 * BOARD_H * BOARD_W       # 128 flattened board input
FEAT_PAD = 384                       # 3 x 128 lanes
HID_PAD = 256                        # [0:100] policy hidden | [128:192] value hidden
OUT_PAD = 128                        # [0:64] log-softmax logits | [64] tanh(value)
N_ACT = BOARD_W * BOARD_H            # 64
POL_HID = 100
VAL_HID = 64
VAL_OFF = 128


def _round_up(v, m):
    return -(-v // m) * m


# ---------------------------------------------------------------------------
# Parameter construction (deterministic numpy/JAX glue)
# ---------------------------------------------------------------------------
def build_D(key):
    """Replicates my_conv.__init__: symmetric 8x8 pattern tensor D[2,C,8,8]."""
    Dic = [[0, 0], [0, 1], [0, 2], [0, 3], [1, 1],
           [1, 2], [1, 3], [2, 2], [2, 3], [3, 3]]
    k1, k2 = jax.random.split(key)
    my = np.asarray(jax.random.uniform(k1, (CHANNEL_NUM, 10)), dtype=np.float64)
    his = np.asarray(jax.random.uniform(k2, (CHANNEL_NUM, 10)), dtype=np.float64)
    D = np.zeros((2, CHANNEL_NUM, 8, 8), dtype=np.float64)
    for j in range(CHANNEL_NUM):
        for i in range(10):
            for (x, y) in [(Dic[i][0], Dic[i][1]),
                           (7 - Dic[i][0], Dic[i][1]),
                           (Dic[i][0], 7 - Dic[i][1]),
                           (7 - Dic[i][0], 7 - Dic[i][1])]:
                D[0, j, x, y] = my[j, i]
                D[0, j, y, x] = my[j, i]
                D[1, j, x, y] = his[j, i]
                D[1, j, y, x] = his[j, i]
    return D


def build_conv_matrix(D):
    """Express my_conv.__call__ as a (128, 276) linear map of the flat input."""
    W = np.zeros((FEAT_DIM, 2, 8, 8), dtype=np.float64)
    cnt = 0
    # 1) rows: dot(input[b, p, i, :], D[p, j, i, :])
    for j in range(CHANNEL_NUM):
        for i in range(8):
            W[cnt, 0, i, :] = D[0, j, i, :]; cnt += 1
            W[cnt, 1, i, :] = D[1, j, i, :]; cnt += 1
    # 2) columns: dot(input[b, p, :, i], D[p, j, i, :])
    for j in range(CHANNEL_NUM):
        for i in range(8):
            W[cnt, 0, :, i] = D[0, j, i, :]; cnt += 1
            W[cnt, 1, :, i] = D[1, j, i, :]; cnt += 1
    # 3) main diagonals
    for j in range(CHANNEL_NUM):
        for i in range(15):
            x, y = (0, i) if i <= 7 else (i - 7, 0)
            i0, i1 = cnt, cnt + 1
            while 0 <= x <= 7 and 0 <= y <= 7:
                W[i0, 0, x, y] = D[0, j, x, y]
                W[i1, 1, x, y] = D[1, j, x, y]
                x += 1; y += 1
            cnt += 2
    # 4) anti-diagonals
    for j in range(CHANNEL_NUM):
        for i in range(15):
            x, y = (0, i) if i <= 7 else (i - 7, 7)
            i0, i1 = cnt, cnt + 1
            while 0 <= x <= 7 and 0 <= y <= 7:
                W[i0, 0, x, y] = D[0, j, x, y]
                W[i1, 1, x, y] = D[1, j, x, y]
                x += 1; y -= 1
            cnt += 2
    assert cnt == FEAT_DIM
    return jnp.asarray(W.reshape(FEAT_DIM, IN_DIM).T, dtype=jnp.float32)  # (128, 276)


def linear_params(key, fan_in, fan_out):
    """PyTorch nn.Linear default init; W stored as (in, out)."""
    kw, kb = jax.random.split(key)
    bound = 1.0 / np.sqrt(fan_in)
    w = jax.random.uniform(kw, (fan_in, fan_out), minval=-bound, maxval=bound,
                           dtype=jnp.float32)
    b = jax.random.uniform(kb, (1, fan_out), minval=-bound, maxval=bound,
                           dtype=jnp.float32)
    return w, b


def pack_params(W_conv, wa1, ba1, wa2, ba2, wv1, bv1, wv2, bv2):
    """Pack into lane-aligned bf16 weight matrices + small f32 bias/mask rows."""
    wc = jnp.zeros((IN_DIM, FEAT_PAD), jnp.float32).at[:, :FEAT_DIM].set(W_conv)

    # fused act_fc1 + val_fc1
    wh = jnp.zeros((FEAT_PAD, HID_PAD), jnp.float32)
    wh = wh.at[:FEAT_DIM, :POL_HID].set(wa1)
    wh = wh.at[:FEAT_DIM, VAL_OFF:VAL_OFF + VAL_HID].set(wv1)
    bh = jnp.zeros((1, HID_PAD), jnp.float32)
    bh = bh.at[0, :POL_HID].set(ba1[0])
    bh = bh.at[0, VAL_OFF:VAL_OFF + VAL_HID].set(bv1[0])

    # fused act_fc2 + val_fc2: lanes 0..63 = logits, lane 64 = value
    wo = jnp.zeros((HID_PAD, OUT_PAD), jnp.float32)
    wo = wo.at[:POL_HID, :N_ACT].set(wa2)
    wo = wo.at[VAL_OFF:VAL_OFF + VAL_HID, N_ACT].set(wv2[:, 0])
    bo = jnp.zeros((1, OUT_PAD), jnp.float32)
    bo = bo.at[0, :N_ACT].set(ba2[0])
    bo = bo.at[0, N_ACT].set(bv2[0, 0])

    # constant rows replacing per-step iota masks
    lane = np.arange(OUT_PAD)
    negm = jnp.asarray(np.where(lane < N_ACT, 0.0, -1e30)[None, :],
                       dtype=jnp.float32)                       # additive softmax mask
    vsel = jnp.asarray((lane == N_ACT).astype(np.float32)[None, :])  # value-lane select

    return (wc.astype(jnp.bfloat16), wh.astype(jnp.bfloat16), bh,
            wo.astype(jnp.bfloat16), bo, negm, vsel)


# ---------------------------------------------------------------------------
# Pallas kernel: whole forward pass, one lane-dense output slab
# ---------------------------------------------------------------------------
def net_kernel(x_ref, wc_ref, wh_ref, bh_ref, wo_ref, bo_ref, negm_ref,
               vsel_ref, out_ref):
    # myconv as a dense matmul: bf16 x bf16 -> f32 (native MXU path), relu in f32.
    feat = jnp.maximum(
        jnp.dot(x_ref[...], wc_ref[...], preferred_element_type=jnp.float32),
        0.0)                                                        # (TB, 384) f32

    # fused act_fc1 + val_fc1 (+ f32 biases via broadcast add), relu in f32.
    h = jnp.maximum(
        jnp.dot(feat.astype(jnp.bfloat16), wh_ref[...],
                preferred_element_type=jnp.float32) + bh_ref[...],
        0.0)                                                        # (TB, 256) f32

    # fused act_fc2 + val_fc2 (+ biases): lanes 0..63 logits, lane 64 value.
    out = jnp.dot(h.astype(jnp.bfloat16), wo_ref[...],
                  preferred_element_type=jnp.float32) + bo_ref[...]  # (TB, 128) f32

    # Stable log_softmax over the logit lanes only. Non-logit lanes are pushed
    # to -1e30 via a broadcast add of a constant row (no per-step iota), so
    # exp on those lanes underflows exactly to 0 and never sees the raw value
    # lane (no transient inf).
    masked = out + negm_ref[...]
    m = jnp.max(masked, axis=-1, keepdims=True)
    p = jnp.exp(masked - m)
    lse = jnp.log(jnp.sum(p, axis=-1, keepdims=True)) + m
    logp = out - lse

    # Lane-dense store: [log_softmax(64) | tanh(value) | don't-care lanes].
    is_val = vsel_ref[...] != 0.0            # (1, OUT_PAD) bool, broadcast over rows
    out_ref[...] = jnp.where(is_val, jnp.tanh(out), logp)


def net_forward(state_input, packed_params, *, batch_tile=2048):
    wc, wh, bh, wo, bo, negm, vsel = packed_params
    B = state_input.shape[0]
    # Board planes are small values (exact in bf16); bf16 input halves HBM bytes.
    x = state_input.reshape(B, IN_DIM).astype(jnp.bfloat16)

    # --- batch tile selection ------------------------------------------------
    # TB is a multiple of 16 (bf16 (16,128) tile). Mid-size batches get >=2
    # grid steps so both v7x TensorCores participate; for large batches prefer
    # a tile that divides B so no padded copy of x is materialized.
    batch_tile = max(16, _round_up(batch_tile, 16))
    B16 = _round_up(B, 16)
    if B16 <= batch_tile:
        TB = _round_up(B16 // 2, 16) if B16 >= 128 else B16
    else:
        TB = batch_tile
        if B % 16 == 0:
            for cand in range(batch_tile, batch_tile // 2 - 1, -16):
                if B % cand == 0:
                    TB = cand
                    break
    B_pad = _round_up(B, TB)
    if B_pad != B:
        x = jnp.pad(x, ((0, B_pad - B), (0, 0)))

    flops = 2 * B_pad * (IN_DIM * FEAT_PAD + FEAT_PAD * HID_PAD + HID_PAD * OUT_PAD)
    bytes_accessed = ((wc.size + wh.size + wo.size) * 2
                      + (bh.size + bo.size + negm.size + vsel.size) * 4
                      + B_pad * (IN_DIM * 2 + OUT_PAD * 4))
    cost = pl.CostEstimate(flops=flops,
                           transcendentals=B_pad * (2 * OUT_PAD + 1),
                           bytes_accessed=bytes_accessed)

    out = pl.pallas_call(
        net_kernel,
        out_shape=jax.ShapeDtypeStruct((B_pad, OUT_PAD), jnp.float32),
        grid_spec=pltpu.PrefetchScalarGridSpec(
            num_scalar_prefetch=0,
            grid=(B_pad // TB,),
            in_specs=[
                pl.BlockSpec((TB, IN_DIM), lambda i: (i, 0)),
                pl.BlockSpec((IN_DIM, FEAT_PAD), lambda i: (0, 0)),
                pl.BlockSpec((FEAT_PAD, HID_PAD), lambda i: (0, 0)),
                pl.BlockSpec((1, HID_PAD), lambda i: (0, 0)),
                pl.BlockSpec((HID_PAD, OUT_PAD), lambda i: (0, 0)),
                pl.BlockSpec((1, OUT_PAD), lambda i: (0, 0)),
                pl.BlockSpec((1, OUT_PAD), lambda i: (0, 0)),
                pl.BlockSpec((1, OUT_PAD), lambda i: (0, 0)),
            ],
            out_specs=pl.BlockSpec((TB, OUT_PAD), lambda i: (i, 0)),
        ),
        compiler_params=pltpu.CompilerParams(
            dimension_semantics=("parallel",)),
        cost_estimate=cost,
    )(x, wc, wh, bh, wo, bo, negm, vsel)

    return out[:B, :N_ACT], out[:B, N_ACT:N_ACT + 1]


# ---------------------------------------------------------------------------
# Pure-JAX references
# ---------------------------------------------------------------------------
def net_reference(state_input, raw_params):
    """Original module semantics, full f32."""
    W_conv, wa1, ba1, wa2, ba2, wv1, bv1, wv2, bv2 = raw_params
    B = state_input.shape[0]
    x = state_input.reshape(B, -1).astype(jnp.float32)
    feat = jax.nn.relu(x @ W_conv)
    h_a = jax.nn.relu(feat @ wa1 + ba1)
    act = jax.nn.log_softmax(h_a @ wa2 + ba2, axis=1)
    h_v = jax.nn.relu(feat @ wv1 + bv1)
    val = jnp.tanh(h_v @ wv2 + bv2)
    return act, val


def net_reference_quantized(state_input, raw_params):
    """Mimics kernel numerics: bf16 weights & dot operands, f32 accumulate/math."""
    W_conv, wa1, ba1, wa2, ba2, wv1, bv1, wv2, bv2 = raw_params
    bf = lambda a: a.astype(jnp.bfloat16)
    B = state_input.shape[0]
    x = bf(state_input.reshape(B, -1))
    feat = jax.nn.relu(jnp.dot(x, bf(W_conv), preferred_element_type=jnp.float32))
    fb = bf(feat)
    h_a = jax.nn.relu(jnp.dot(fb, bf(wa1), preferred_element_type=jnp.float32) + ba1)
    h_v = jax.nn.relu(jnp.dot(fb, bf(wv1), preferred_element_type=jnp.float32) + bv1)
    act = jax.nn.log_softmax(
        jnp.dot(bf(h_a), bf(wa2), preferred_element_type=jnp.float32) + ba2, axis=1)
    val = jnp.tanh(
        jnp.dot(bf(h_v), bf(wv2), preferred_element_type=jnp.float32) + bv2)
    return act, val


if __name__ == "__main__":
    key = jax.random.PRNGKey(0)
    k_d, k_a1, k_a2, k_v1, k_v2, k_x = jax.random.split(key, 6)

    # Parameters (same shapes / init style as the PyTorch Net)
    # TODO(synk): torch.rand draws are reproduced with jax.random (same
    # distribution, different values) since torch RNG has no Pallas equivalent.
    W_conv = build_conv_matrix(build_D(k_d))
    wa1, ba1 = linear_params(k_a1, FEAT_DIM, POL_HID)
    wa2, ba2 = linear_params(k_a2, POL_HID, N_ACT)
    wv1, bv1 = linear_params(k_v1, FEAT_DIM, VAL_HID)
    wv2, bv2 = linear_params(k_v2, VAL_HID, 1)

    raw_params = (W_conv, wa1, ba1, wa2, ba2, wv1, bv1, wv2, bv2)
    packed = pack_params(*raw_params)

    # Input: batch=2, planes=2 (my / his), 8x8 board (NCHW)
    state_input = jax.random.uniform(k_x, (2, 2, BOARD_H, BOARD_W),
                                     dtype=jnp.float32)

    act_out, val_out = net_forward(state_input, packed)
    jax.block_until_ready((act_out, val_out))
    assert act_out.shape == (2, N_ACT)
    assert val_out.shape == (2, 1)

    # Tight check against a reference using the same bf16 weight/operand numerics
    act_q, val_q = net_reference_quantized(state_input, raw_params)
    np.testing.assert_allclose(np.asarray(act_out), np.asarray(act_q),
                               atol=2e-3, rtol=2e-3)
    np.testing.assert_allclose(np.asarray(val_out), np.asarray(val_q),
                               atol=2e-3, rtol=2e-3)

    # Loose check against the full-f32 module semantics (deliberate bf16
    # quantization of weights + dot operands is the only difference).
    act_ref, val_ref = net_reference(state_input, raw_params)
    np.testing.assert_allclose(np.asarray(act_out), np.asarray(act_ref),
                               atol=5e-2, rtol=5e-2)
    np.testing.assert_allclose(np.asarray(val_out), np.asarray(val_ref),
                               atol=5e-2, rtol=5e-2)

    print("KERNEL_OK")
</pallas_src>

<mosaic_0001>
module attributes {stable_mosaic.version = 11 : i64} {
  func.func @net_kernel(%arg0: i32, %arg1: memref<16x128xbf16, #tpu.memory_space<vmem>>, %arg2: memref<128x384xbf16, #tpu.memory_space<vmem>>, %arg3: memref<384x256xbf16, #tpu.memory_space<vmem>>, %arg4: memref<1x256xf32, #tpu.memory_space<vmem>>, %arg5: memref<256x128xbf16, #tpu.memory_space<vmem>>, %arg6: memref<1x128xf32, #tpu.memory_space<vmem>>, %arg7: memref<1x128xf32, #tpu.memory_space<vmem>>, %arg8: memref<1x128xf32, #tpu.memory_space<vmem>>, %arg9: memref<16x128xf32, #tpu.memory_space<vmem>>) attributes {dimension_semantics = [#tpu.dimension_semantics<parallel>], iteration_bounds = array<i64: 1>, scalar_prefetch = 0 : i64, scratch_operands = 0 : i64, tpu.core_type = #tpu.core_type<tc>, window_params = [{transform_indices = @transform_0, window_bounds = array<i64: 16, 128>}, {pipeline_mode = #tpu.pipeline_mode<synchronous>, transform_indices = @transform_1, window_bounds = array<i64: 128, 384>}, {pipeline_mode = #tpu.pipeline_mode<synchronous>, transform_indices = @transform_2, window_bounds = array<i64: 384, 256>}, {pipeline_mode = #tpu.pipeline_mode<synchronous>, transform_indices = @transform_3, window_bounds = array<i64: 1, 256>}, {pipeline_mode = #tpu.pipeline_mode<synchronous>, transform_indices = @transform_4, window_bounds = array<i64: 256, 128>}, {pipeline_mode = #tpu.pipeline_mode<synchronous>, transform_indices = @transform_5, window_bounds = array<i64: 1, 128>}, {pipeline_mode = #tpu.pipeline_mode<synchronous>, transform_indices = @transform_6, window_bounds = array<i64: 1, 128>}, {pipeline_mode = #tpu.pipeline_mode<synchronous>, transform_indices = @transform_7, window_bounds = array<i64: 1, 128>}, {transform_indices = @transform_8, window_bounds = array<i64: 16, 128>}]} {
    %c0 = arith.constant 0 : index
    %c0_0 = arith.constant 0 : index
    %0 = vector.load %arg1[%c0, %c0_0] : memref<16x128xbf16, #tpu.memory_space<vmem>>, vector<16x128xbf16>
    %c0_1 = arith.constant 0 : index
    %c0_2 = arith.constant 0 : index
    %1 = vector.load %arg2[%c0_1, %c0_2] : memref<128x384xbf16, #tpu.memory_space<vmem>>, vector<128x384xbf16>
    %cst = arith.constant dense<0.000000e+00> : vector<16x384xf32>
    %2 = tpu.matmul %0, %1, %cst {dimension_numbers = #tpu.dot_dimension_numbers<[1], [0], [0], [1], [0, 0, 1, 1], [], []>} : vector<16x128xbf16>, vector<128x384xbf16>, vector<16x384xf32> -> vector<16x384xf32>
    %cst_3 = arith.constant 0.000000e+00 : f32
    %3 = vector.broadcast %cst_3 : f32 to vector<16x384xf32>
    %4 = arith.maximumf %2, %3 : vector<16x384xf32>
    %5 = arith.truncf %4 : vector<16x384xf32> to vector<16x384xbf16>
    %c0_4 = arith.constant 0 : index
    %c0_5 = arith.constant 0 : index
    %6 = vector.load %arg3[%c0_4, %c0_5] : memref<384x256xbf16, #tpu.memory_space<vmem>>, vector<384x256xbf16>
    %cst_6 = arith.constant dense<0.000000e+00> : vector<16x256xf32>
    %7 = tpu.matmul %5, %6, %cst_6 {dimension_numbers = #tpu.dot_dimension_numbers<[1], [0], [0], [1], [0, 0, 1, 1], [], []>} : vector<16x384xbf16>, vector<384x256xbf16>, vector<16x256xf32> -> vector<16x256xf32>
    %c0_7 = arith.constant 0 : index
    %c0_8 = arith.constant 0 : index
    %8 = vector.load %arg4[%c0_7, %c0_8] : memref<1x256xf32, #tpu.memory_space<vmem>>, vector<1x256xf32>
    %9 = vector.broadcast %8 : vector<1x256xf32> to vector<16x256xf32>
    %10 = arith.addf %7, %9 : vector<16x256xf32>
    %cst_9 = arith.constant 0.000000e+00 : f32
    %11 = vector.broadcast %cst_9 : f32 to vector<16x256xf32>
    %12 = arith.maximumf %10, %11 : vector<16x256xf32>
    %13 = arith.truncf %12 : vector<16x256xf32> to vector<16x256xbf16>
    %c0_10 = arith.constant 0 : index
    %c0_11 = arith.constant 0 : index
    %14 = vector.load %arg5[%c0_10, %c0_11] : memref<256x128xbf16, #tpu.memory_space<vmem>>, vector<256x128xbf16>
    %cst_12 = arith.constant dense<0.000000e+00> : vector<16x128xf32>
    %15 = tpu.matmul %13, %14, %cst_12 {dimension_numbers = #tpu.dot_dimension_numbers<[1], [0], [0], [1], [0, 0, 1, 1], [], []>} : vector<16x256xbf16>, vector<256x128xbf16>, vector<16x128xf32> -> vector<16x128xf32>
    %c0_13 = arith.constant 0 : index
    %c0_14 = arith.constant 0 : index
    %16 = vector.load %arg6[%c0_13, %c0_14] : memref<1x128xf32, #tpu.memory_space<vmem>>, vector<1x128xf32>
    %17 = vector.broadcast %16 : vector<1x128xf32> to vector<16x128xf32>
    %18 = arith.addf %15, %17 : vector<16x128xf32>
    %c0_15 = arith.constant 0 : index
    %c0_16 = arith.constant 0 : index
    %19 = vector.load %arg7[%c0_15, %c0_16] : memref<1x128xf32, #tpu.memory_space<vmem>>, vector<1x128xf32>
    %20 = vector.broadcast %19 : vector<1x128xf32> to vector<16x128xf32>
    %21 = arith.addf %18, %20 : vector<16x128xf32>
    %cst_17 = arith.constant dense<0xFF800000> : vector<16xf32>
    %22 = vector.multi_reduction <maximumf>, %21, %cst_17 [1] : vector<16x128xf32> to vector<16xf32>
    %23 = vector.shape_cast %22 : vector<16xf32> to vector<16x1xf32>
    %24 = vector.broadcast %23 : vector<16x1xf32> to vector<16x128xf32>
    %25 = arith.subf %21, %24 : vector<16x128xf32>
    %26 = math.exp %25 : vector<16x128xf32>
    %cst_18 = arith.constant dense<0.000000e+00> : vector<16xf32>
    %27 = vector.multi_reduction <add>, %26, %cst_18 [1] : vector<16x128xf32> to vector<16xf32>
    %28 = vector.shape_cast %27 : vector<16xf32> to vector<16x1xf32>
    %29 = math.log %28 : vector<16x1xf32>
    %30 = arith.addf %29, %23 : vector<16x1xf32>
    %31 = vector.broadcast %30 : vector<16x1xf32> to vector<16x128xf32>
    %32 = arith.subf %18, %31 : vector<16x128xf32>
    %c0_19 = arith.constant 0 : index
    %c0_20 = arith.constant 0 : index
    %33 = vector.load %arg8[%c0_19, %c0_20] : memref<1x128xf32, #tpu.memory_space<vmem>>, vector<1x128xf32>
    %cst_21 = arith.constant 0.000000e+00 : f32
    %34 = vector.broadcast %cst_21 : f32 to vector<1x128xf32>
    %35 = arith.cmpf one, %33, %34 : vector<1x128xf32>
    %36 = math.tanh %18 : vector<16x128xf32>
    %37 = vector.shape_cast %35 : vector<1x128xi1> to vector<1x128xi1>
    %38 = vector.broadcast %37 : vector<1x128xi1> to vector<16x128xi1>
    %39 = arith.select %38, %36, %32 : vector<16x128xi1>, vector<16x128xf32>
    %c0_22 = arith.constant 0 : index
    %c0_23 = arith.constant 0 : index
    %40 = vector.load %arg9[%c0_22, %c0_23] : memref<16x128xf32, #tpu.memory_space<vmem>>, vector<16x128xf32>
    tpu.vector_store %arg9[%c0_22, %c0_23], %39 {strides = array<i32>} : memref<16x128xf32, #tpu.memory_space<vmem>>, vector<16x128xf32>,
    return
  }
  func.func @transform_0(%arg0: i32) -> (i32, i32) {
    %c0_i32 = arith.constant 0 : i32
    %c0_i32_0 = arith.constant 0 : i32
    return %arg0, %c0_i32 : i32, i32
  }
  func.func @transform_1(%arg0: i32) -> (i32, i32) {
    %c0_i32 = arith.constant 0 : i32
    %c0_i32_0 = arith.constant 0 : i32
    %c0_i32_1 = arith.constant 0 : i32
    return %c0_i32, %c0_i32_0 : i32, i32
  }
  func.func @transform_2(%arg0: i32) -> (i32, i32) {
    %c0_i32 = arith.constant 0 : i32
    %c0_i32_0 = arith.constant 0 : i32
    %c0_i32_1 = arith.constant 0 : i32
    return %c0_i32, %c0_i32_0 : i32, i32
  }
  func.func @transform_3(%arg0: i32) -> (i32, i32) {
    %c0_i32 = arith.constant 0 : i32
    %c0_i32_0 = arith.constant 0 : i32
    %c0_i32_1 = arith.constant 0 : i32
    return %c0_i32, %c0_i32_0 : i32, i32
  }
  func.func @transform_4(%arg0: i32) -> (i32, i32) {
    %c0_i32 = arith.constant 0 : i32
    %c0_i32_0 = arith.constant 0 : i32
    %c0_i32_1 = arith.constant 0 : i32
    return %c0_i32, %c0_i32_0 : i32, i32
  }
  func.func @transform_5(%arg0: i32) -> (i32, i32) {
    %c0_i32 = arith.constant 0 : i32
    %c0_i32_0 = arith.constant 0 : i32
    %c0_i32_1 = arith.constant 0 : i32
    return %c0_i32, %c0_i32_0 : i32, i32
  }
  func.func @transform_6(%arg0: i32) -> (i32, i32) {
    %c0_i32 = arith.constant 0 : i32
    %c0_i32_0 = arith.constant 0 : i32
    %c0_i32_1 = arith.constant 0 : i32
    return %c0_i32, %c0_i32_0 : i32, i32
  }
  func.func @transform_7(%arg0: i32) -> (i32, i32) {
    %c0_i32 = arith.constant 0 : i32
    %c0_i32_0 = arith.constant 0 : i32
    %c0_i32_1 = arith.constant 0 : i32
    return %c0_i32, %c0_i32_0 : i32, i32
  }
  func.func @transform_8(%arg0: i32) -> (i32, i32) {
    %c0_i32 = arith.constant 0 : i32
    %c0_i32_0 = arith.constant 0 : i32
    return %arg0, %c0_i32 : i32, i32
  }
}

</mosaic_0001>

<bundles_post_ra>
// kernel: tpu_custom_call.1
= control target key start
LH: loop header
LB: loop body
LE: loop exit
PB: predicated region body
PF: predicated region fallthrough
CT: control target
= control target key end

     0   :  { %13 = vsyncpa [#allocation3], 0  ;;  %s1613_s0 = inlined_call_operand.hbm [shape: bf16[16,128], index: 0, kind: input, shape index: {}]   ;;  %s1614_s1 = inlined_call_operand.hbm [shape: bf16[128,384], index: 1, kind: input, shape index: {}]   ;;  %s1615_s2 = inlined_call_operand.hbm [shape: bf16[384,256], index: 2, kind: input, shape index: {}]   ;;  %s1616_s3 = inlined_call_operand.vmem [shape: f32[1,256], index: 3, kind: input, shape index: {}]   ;;  %s1617_s4 = inlined_call_operand.hbm [shape: bf16[256,128], index: 4, kind: input, shape index: {}]   ;;  %s1618_s5 = inlined_call_operand.vmem [shape: f32[1,128], index: 5, kind: input, shape index: {}]   ;;  %s1619_s6 = inlined_call_operand.vmem [shape: f32[1,128], index: 6, kind: input, shape index: {}]   ;;  %s1620_s7 = inlined_call_operand.vmem [shape: f32[1,128], index: 7, kind: input, shape index: {}]   ;;  %s1621_s8 = inlined_call_operand.hbm [shape: f32[16,128], index: 8, kind: output, shape index: {}]  }
   0x1   :  { %14 = vsyncpa [#allocation6], 0 }
   0x2   :  { %15 = vsyncpa [#allocation9], 0  ;;  %s34_s29 = sshll.u32 %s1614_s1, 4  ;;  %s35_s29 = int_to_ptr.hbm [resolvable:$true] %s34_s29 }
   0x3   :  { %16 = vsyncpa [#allocation4], 0  ;;  %s1515_s30 = smov [#allocation5]   ;;  %s21_s12 = sshll.u32 %s1613_s0, 4  ;;  %s22_s12 = int_to_ptr.hbm [resolvable:$true] %s21_s12 }
   0x4   :  { %s36_s9 = sshll.u32 %s1515_s30, 4  ;;  %s1516_s13 = smov 192   ;;  %s37_s9 = int_to_ptr.vmem [resolvable:$true] %s36_s9 }
   0x5   :  { %s1517_s14 = smov 12   ;;  %s1518_s15 = smov [#allocation2]  }
   0x6   :  { %42 = dma.hbm_to_vmem [thread:$0]  %s35_s29, 3072, %s37_s9, [#allocation6], %s1516_s13, %s1516_s13, %s1517_s14  }
   0x7   :  { %s23_s16 = sshll.u32 %s1518_s15, 4  ;;  %s1519_s17 = smov 64   ;;  %s24_s16 = int_to_ptr.vmem [resolvable:$true] %s23_s16 }
   0x8   :  { %s1520_s18 = smov 4   ;;  %s47_s20 = sshll.u32 %s1615_s2, 4  ;;  %s48_s20 = int_to_ptr.hbm [resolvable:$true] %s47_s20 }
   0x9   :  { %29 = dma.hbm_to_vmem [thread:$0]  %s22_s12, 128, %s24_s16, [#allocation3], %s1519_s17, %s1519_s17, %s1520_s18  }
   0xa   :  { %s1521_s21 = smov [#allocation7]   ;;  %s62_s24 = sshll.u32 %s1617_s4, 4  ;;  %s63_s24 = int_to_ptr.hbm [resolvable:$true] %s62_s24 }
   0xb   :  { %s49_s22 = sshll.u32 %s1521_s21, 4  ;;  %s1522_s25 = smov 128   ;;  %s50_s22 = int_to_ptr.vmem [resolvable:$true] %s49_s22 }
   0xc   :  { %s1523_s26 = smov 8   ;;  %s1524_s27 = smov [#allocation8]  }
   0xd   :  { %55 = dma.hbm_to_vmem [thread:$0]  %s48_s20, 6144, %s50_s22, [#allocation6], %s1522_s25, %s1522_s25, %s1523_s26  }
   0xe   :  { %s64_s28 = sshll.u32 %s1524_s27, 4  ;;  %s65_s28 = int_to_ptr.vmem [resolvable:$true] %s64_s28 }
   0xf   :  { %70 = dma.hbm_to_vmem [thread:$0]  %s63_s24, 2048, %s65_s28, [#allocation9], %s1519_s17, %s1519_s17, %s1520_s18  }
  0x10   :  { %1507 = dma.done.wait [#allocation3], 128  }
  0x11   :  { %1508 = vsyncadd [#allocation3], 4294967168 }
  0x12   :  { %1509 = dma.done.wait [#allocation6], 9216  }
  0x13   :  { %1510 = vsyncadd [#allocation6], 4294958080 }
  0x14   :  { %1511 = dma.done.wait [#allocation9], 2048  }
  0x15   :  { %1512 = vsyncadd [#allocation9], 4294965248  ;;  %v1006_v0 = vld [vmem:[#allocation5 + $0xa8] sm:$0xf]  ;;  %v1295_v1 = vld [vmem:[#allocation5 + $0xb0] sm:$0xf0] }
  0x16   :  { %v1294_v2 = vld [vmem:[#allocation5 + $0xac] sm:$0xf]  ;;  %v1007_v3 = vor.u32 %v1295_v1, %v1006_v0  ;;  %v1008_v4 = vld [vmem:[#allocation5 + $0xb4] sm:$0xf0]  ;;  %v1014_v5 = vld [vmem:[#allocation5 + $0xb0] sm:$0xf] }
  0x17   :  { %v1296_v6 = vld [vmem:[#allocation5 + $0xb8] sm:$0xf0]  ;;  %v1011_v7 = vor.u32 %v1294_v2, %v1008_v4  ;;  %v994_v9 = vld [vmem:[#allocation5 + $0x90] sm:$0xf]  ;;  %v1291_v11 = vld [vmem:[#allocation5 + $0x94] sm:$0xf] }
  0x18   :  { %v1015_v8 = vor.u32 %v1296_v6, %v1014_v5  ;;  %v1292_v10 = vld [vmem:[#allocation5 + $0x98] sm:$0xf0]  ;;  %261 = vmatpush.bf16.msra.mxu0 %v1007_v3  ;;  %v996_v13 = vld [vmem:[#allocation5 + $0x9c] sm:$0xf0]  ;;  %v1002_v14 = vld [vmem:[#allocation5 + $0x98] sm:$0xf] }
  0x19   :  { %v995_v12 = vor.u32 %v1292_v10, %v994_v9  ;;  %v1293_v15 = vld [vmem:[#allocation5 + $0xa0] sm:$0xf0]  ;;  %275 = vmatpush.bf16.msra.mxu1 %v1011_v7  ;;  %v999_v16 = vor.u32 %v1291_v11, %v996_v13  ;;  %v982_v18 = vld [vmem:[#allocation5 + $0x78] sm:$0xf]  ;;  %v1288_v20 = vld [vmem:[#allocation5 + $0x7c] sm:$0xf] }
  0x1a   :  { %289 = vmatpush.bf16.msra.mxu2 %v1015_v8  ;;  %v1003_v17 = vor.u32 %v1293_v15, %v1002_v14  ;;  %v1289_v19 = vld [vmem:[#allocation5 + $0x80] sm:$0xf0]  ;;  %v984_v21 = vld [vmem:[#allocation5 + $0x84] sm:$0xf0]  ;;  %v990_v22 = vld [vmem:[#allocation5 + $0x80] sm:$0xf] }
  0x1b   :  { %v1290_v23 = vld [vmem:[#allocation5 + $0x88] sm:$0xf0]  ;;  %v983_v24 = vor.u32 %v1289_v19, %v982_v18  ;;  %v987_v25 = vor.u32 %v1288_v20, %v984_v21  ;;  %v970_v27 = vld [vmem:[#allocation5 + $0x60] sm:$0xf]  ;;  %v1285_v29 = vld [vmem:[#allocation5 + $0x64] sm:$0xf] }
  0x1c   :  { %262 = vmatpush.bf16.msra.mxu0 %v995_v12  ;;  %v991_v26 = vor.u32 %v1290_v23, %v990_v22  ;;  %v1286_v28 = vld [vmem:[#allocation5 + $0x68] sm:$0xf0]  ;;  %v972_v30 = vld [vmem:[#allocation5 + $0x6c] sm:$0xf0]  ;;  %v978_v31 = vld [vmem:[#allocation5 + $0x68] sm:$0xf] }
  0x1d   :  { %276 = vmatpush.bf16.msra.mxu1 %v999_v16  ;;  %v1287_v32 = vld [vmem:[#allocation5 + $0x70] sm:$0xf0]  ;;  %v971_v33 = vor.u32 %v1286_v28, %v970_v27  ;;  %v975_v34 = vor.u32 %v1285_v29, %v972_v30  ;;  %v958_v36 = vld [vmem:[#allocation5 + $0x48] sm:$0xf]  ;;  %v1282_v38 = vld [vmem:[#allocation5 + $0x4c] sm:$0xf] }
  0x1e   :  { %290 = vmatpush.bf16.msra.mxu2 %v1003_v17  ;;  %v979_v35 = vor.u32 %v1287_v32, %v978_v31  ;;  %v1283_v37 = vld [vmem:[#allocation5 + $0x50] sm:$0xf0]  ;;  %v960_v39 = vld [vmem:[#allocation5 + $0x54] sm:$0xf0]  ;;  %v966_v40 = vld [vmem:[#allocation5 + $0x50] sm:$0xf] }
  0x1f   :  { %v1284_v41 = vld [vmem:[#allocation5 + $0x58] sm:$0xf0]  ;;  %v959_v42 = vor.u32 %v1283_v37, %v958_v36  ;;  %v946_v43 = vld [vmem:[#allocation5 + $0x30] sm:$0xf]  ;;  %v1279_v45 = vld [vmem:[#allocation5 + $0x34] sm:$0xf]  ;;  %v963_v46 = vor.u32 %v1282_v38, %v960_v39 }
  0x20   :  { %263 = vmatpush.bf16.msra.mxu0 %v983_v24  ;;  %v1280_v44 = vld [vmem:[#allocation5 + $0x38] sm:$0xf0]  ;;  %v967_v47 = vor.u32 %v1284_v41, %v966_v40  ;;  %v948_v48 = vld [vmem:[#allocation5 + $0x3c] sm:$0xf0]  ;;  %v1074_v49 = vld [vmem:[#allocation7 + $0x70] sm:$0xf] }
  0x21   :  { %277 = vmatpush.bf16.msra.mxu1 %v987_v25  ;;  %v1312_v50 = vld [vmem:[#allocation7 + $0x74] sm:$0xf0]  ;;  %v1281_v52 = vld [vmem:[#allocation5 + $0x40] sm:$0xf0]  ;;  %v1066_v54 = vld [vmem:[#allocation7 + $0x60] sm:$0xf]  ;;  %v947_v56 = vor.u32 %v1280_v44, %v946_v43  ;;  %v951_v60 = vor.u32 %v1279_v45, %v948_v48 }
  0x22   :  { %291 = vmatpush.bf16.msra.mxu2 %v991_v26  ;;  %v954_v51 = vld [vmem:[#allocation5 + $0x38] sm:$0xf]  ;;  %v1075_v53 = vor.u32 %v1312_v50, %v1074_v49  ;;  %v1310_v55 = vld [vmem:[#allocation7 + $0x64] sm:$0xf0]  ;;  %v1277_v58 = vld [vmem:[#allocation5 + $0x20] sm:$0xf0] }
  0x23   :  { %v934_v57 = vld [vmem:[#allocation5 + $0x18] sm:$0xf]  ;;  %v1067_v59 = vor.u32 %v1310_v55, %v1066_v54  ;;  %v955_v61 = vor.u32 %v1281_v52, %v954_v51  ;;  %v1276_v62 = vld [vmem:[#allocation5 + $0x1c] sm:$0xf]  ;;  %v1058_v63 = vld [vmem:[#allocation7 + $0x50] sm:$0xf] }
  0x24   :  { %264 = vmatpush.bf16.msra.mxu0 %v971_v33  ;;  %606 = vmatpush.bf16.msra.mxu3 %v1075_v53  ;;  %v1308_v0 = vld [vmem:[#allocation7 + $0x54] sm:$0xf0]  ;;  %v936_v1 = vld [vmem:[#allocation5 + $0x24] sm:$0xf0]  ;;  %v942_v2 = vld [vmem:[#allocation5 + $0x20] sm:$0xf]  ;;  %v935_v4 = vor.u32 %v1277_v58, %v934_v57 }
  0x25   :  { %278 = vmatpush.bf16.msra.mxu1 %v975_v34  ;;  %v1278_v3 = vld [vmem:[#allocation5 + $0x28] sm:$0xf0]  ;;  %v922_v5 = vld [vmem:[#allocation5] sm:$0xf]  ;;  %v1273_v7 = vld [vmem:[#allocation5 + $0x4] sm:$0xf]  ;;  %v1059_v8 = vor.u32 %v1308_v0, %v1058_v63  ;;  %v939_v9 = vor.u32 %v1276_v62, %v936_v1 }
  0x26   :  { %292 = vmatpush.bf16.msra.mxu2 %v979_v35  ;;  %v1274_v6 = vld [vmem:[#allocation5 + $0x8] sm:$0xf0]  ;;  %v943_v10 = vor.u32 %v1278_v3, %v942_v2  ;;  %v924_v11 = vld [vmem:[#allocation5 + $0xc] sm:$0xf0]  ;;  %v1050_v12 = vld [vmem:[#allocation7 + $0x40] sm:$0xf] }
  0x27   :  { %v1306_v13 = vld [vmem:[#allocation7 + $0x44] sm:$0xf0]  ;;  %v1275_v15 = vld [vmem:[#allocation5 + $0x10] sm:$0xf0]  ;;  %v1138_v16 = vld [vmem:[#allocation7 + $0xf0] sm:$0xf]  ;;  %v923_v20 = vor.u32 %v1274_v6, %v922_v5  ;;  %v927_v24 = vor.u32 %v1273_v7, %v924_v11 }
  0x28   :  { %265 = vmatpush.bf16.msra.mxu0 %v959_v42  ;;  %607 = vmatpush.bf16.msra.mxu3 %v1067_v59  ;;  %v930_v14 = vld [vmem:[#allocation5 + $0x8] sm:$0xf]  ;;  %v1328_v17 = vld [vmem:[#allocation7 + $0xf4] sm:$0xf0]  ;;  %v1311_v18 = vld [vmem:[#allocation7 + $0x74] sm:$0xf]  ;;  %v1051_v21 = vor.u32 %v1306_v13, %v1050_v12 }
  0x29   :  { %279 = vmatpush.bf16.msra.mxu1 %v963_v46  ;;  %v1076_v19 = vld [vmem:[#allocation7 + $0x78] sm:$0xf0]  ;;  %v1202_v22 = vld [vmem:[#allocation7 + $0x170] sm:$0xf]  ;;  %v1344_v23 = vld [vmem:[#allocation7 + $0x174] sm:$0xf0]  ;;  %v931_v25 = vor.u32 %v1275_v15, %v930_v14  ;;  %v1139_v27 = vor.u32 %v1328_v17, %v1138_v16 }
  0x2a   :  { %293 = vmatpush.bf16.msra.mxu2 %v967_v47  ;;  %v1272_v26 = vld [vmem:[#allocation2] sm:$0xff]  ;;  %v1130_v28 = vld [vmem:[#allocation7 + $0xe0] sm:$0xf]  ;;  %v1079_v29 = vor.u32 %v1311_v18, %v1076_v19  ;;  %v1042_v30 = vld [vmem:[#allocation7 + $0x30] sm:$0xf]  ;;  %v1203_v35 = vor.u32 %v1344_v23, %v1202_v22  ;;  %s901_s13 = sshll.u32 %s1621_s8, 4  ;;  %s902_s13 = int_to_ptr.hbm [resolvable:$true] %s901_s13 }
  0x2b   :  { %v1304_v31 = vld [vmem:[#allocation7 + $0x34] sm:$0xf0]  ;;  %v1326_v32 = vld [vmem:[#allocation7 + $0xe4] sm:$0xf0]  ;;  %v1309_v33 = vld [vmem:[#allocation7 + $0x64] sm:$0xf] }
  0x2c   :  { %266 = vmatpush.bf16.msra.mxu0 %v947_v56  ;;  %608 = vmatpush.bf16.msra.mxu3 %v1059_v8  ;;  %v1068_v34 = vld [vmem:[#allocation7 + $0x68] sm:$0xf0]  ;;  %v1194_v36 = vld [vmem:[#allocation7 + $0x160] sm:$0xf]  ;;  %v1342_v37 = vld [vmem:[#allocation7 + $0x164] sm:$0xf0]  ;;  %v1043_v40 = vor.u32 %v1304_v31, %v1042_v30  ;;  %v1131_v41 = vor.u32 %v1326_v32, %v1130_v28 }
  0x2d   :  { %280 = vmatpush.bf16.msra.mxu1 %v951_v60  ;;  %v1122_v38 = vld [vmem:[#allocation7 + $0xd0] sm:$0xf]  ;;  %v1324_v39 = vld [vmem:[#allocation7 + $0xd4] sm:$0xf0]  ;;  %v1071_v42 = vor.u32 %v1309_v33, %v1068_v34  ;;  %v1034_v43 = vld [vmem:[#allocation7 + $0x20] sm:$0xf]  ;;  %v1195_v47 = vor.u32 %v1342_v37, %v1194_v36 }
  0x2e   :  { %294 = vmatpush.bf16.msra.mxu2 %v955_v61  ;;  %v1302_v44 = vld [vmem:[#allocation7 + $0x24] sm:$0xf0]  ;;  %v1307_v45 = vld [vmem:[#allocation7 + $0x54] sm:$0xf]  ;;  %v1060_v46 = vld [vmem:[#allocation7 + $0x58] sm:$0xf0]  ;;  %v1123_v51 = vor.u32 %v1324_v39, %v1122_v38 }
  0x2f   :  { %v1186_v48 = vld [vmem:[#allocation7 + $0x150] sm:$0xf]  ;;  %v1340_v49 = vld [vmem:[#allocation7 + $0x154] sm:$0xf0]  ;;  %v1035_v50 = vor.u32 %v1302_v44, %v1034_v43  ;;  %v1114_v52 = vld [vmem:[#allocation7 + $0xc0] sm:$0xf]  ;;  %v1063_v53 = vor.u32 %v1307_v45, %v1060_v46 }
  0x30   :  { %267 = vmatpush.bf16.msra.mxu0 %v935_v4  ;;  %609 = vmatpush.bf16.msra.mxu3 %v1051_v21  ;;  %v1026_v54 = vld [vmem:[#allocation7 + $0x10] sm:$0xf]  ;;  %v1300_v55 = vld [vmem:[#allocation7 + $0x14] sm:$0xf0]  ;;  %v1322_v56 = vld [vmem:[#allocation7 + $0xc4] sm:$0xf0]  ;;  %v1187_v59 = vor.u32 %v1340_v49, %v1186_v48 }
  0x31   :  { %281 = vmatpush.bf16.msra.mxu1 %v939_v9  ;;  %v1305_v57 = vld [vmem:[#allocation7 + $0x44] sm:$0xf]  ;;  %v1052_v58 = vld [vmem:[#allocation7 + $0x48] sm:$0xf0]  ;;  %v1027_v60 = vor.u32 %v1300_v55, %v1026_v54  ;;  %v1115_v61 = vor.u32 %v1322_v56, %v1114_v52  ;;  %v1106_v62 = vld [vmem:[#allocation7 + $0xb0] sm:$0xf] }
  0x32   :  { %295 = vmatpush.bf16.msra.mxu2 %v943_v10  ;;  %v1055_v63 = vor.u32 %v1305_v57, %v1052_v58  ;;  %v1018_v0 = vld [vmem:[#allocation7] sm:$0xf]  ;;  %v1298_v1 = vld [vmem:[#allocation7 + $0x4] sm:$0xf0]  ;;  %v1320_v2 = vld [vmem:[#allocation7 + $0xb4] sm:$0xf0] }
  0x33   :  { %v1303_v3 = vld [vmem:[#allocation7 + $0x34] sm:$0xf]  ;;  %v1044_v4 = vld [vmem:[#allocation7 + $0x38] sm:$0xf0]  ;;  %v1019_v7 = vor.u32 %v1298_v1, %v1018_v0  ;;  %v1107_v8 = vor.u32 %v1320_v2, %v1106_v62  ;;  %v1098_v10 = vld [vmem:[#allocation7 + $0xa0] sm:$0xf] }
  0x34   :  { %268 = vmatpush.bf16.msra.mxu0 %v923_v20  ;;  %610 = vmatpush.bf16.msra.mxu3 %v1043_v40  ;;  %v1327_v5 = vld [vmem:[#allocation7 + $0xf4] sm:$0xf]  ;;  %v1140_v6 = vld [vmem:[#allocation7 + $0xf8] sm:$0xf0]  ;;  %v1047_v9 = vor.u32 %v1303_v3, %v1044_v4  ;;  %v1318_v11 = vld [vmem:[#allocation7 + $0xa4] sm:$0xf0] }
  0x35   :  { %282 = vmatpush.bf16.msra.mxu1 %v927_v24  ;;  %v1143_v12 = vor.u32 %v1327_v5, %v1140_v6  ;;  %v1099_v13 = vor.u32 %v1318_v11, %v1098_v10  ;;  %v1090_v14 = vld [vmem:[#allocation7 + $0x90] sm:$0xf]  ;;  %v1316_v15 = vld [vmem:[#allocation7 + $0x94] sm:$0xf0]  ;;  %v1082_v17 = vld [vmem:[#allocation7 + $0x80] sm:$0xf] }
  0x36   :  { %296 = vmatpush.bf16.msra.mxu2 %v931_v25  ;;  %v1091_v16 = vor.u32 %v1316_v15, %v1090_v14  ;;  %v1314_v18 = vld [vmem:[#allocation7 + $0x84] sm:$0xf0]  ;;  %v1343_v19 = vld [vmem:[#allocation7 + $0x174] sm:$0xf]  ;;  %v1204_v20 = vld [vmem:[#allocation7 + $0x178] sm:$0xf0] }
  0x37   :  { %269 = vmatmul.bf16.vlgmr.msra.gmra.mxu0 %v1272_v26  ;;  %v1083_v21 = vor.u32 %v1314_v18, %v1082_v17  ;;  %v1207_v22 = vor.u32 %v1343_v19, %v1204_v20  ;;  %v1178_v23 = vld [vmem:[#allocation7 + $0x140] sm:$0xf]  ;;  %v1338_v24 = vld [vmem:[#allocation7 + $0x144] sm:$0xf0]  ;;  %v1301_v25 = vld [vmem:[#allocation7 + $0x24] sm:$0xf] }
  0x38   :  { %620 = vmatpush.bf16.msrb.mxu0 %v1139_v27  ;;  %283 = vmatmul.bf16.vlgmr.msra.gmra.mxu1 %v1272_v26  ;;  %v1036_v27 = vld [vmem:[#allocation7 + $0x28] sm:$0xf0]  ;;  %v1325_v28 = vld [vmem:[#allocation7 + $0xe4] sm:$0xf]  ;;  %v1170_v34 = vld [vmem:[#allocation7 + $0x130] sm:$0xf] }
  0x39   :  { %634 = vmatpush.bf16.msrb.mxu1 %v1203_v35  ;;  %297 = vmatmul.bf16.vlgmr.msra.gmra.mxu2 %v1272_v26  ;;  %v1179_v26 = vor.u32 %v1338_v24, %v1178_v23  ;;  %v1039_v30 = vor.u32 %v1301_v25, %v1036_v27  ;;  %v1341_v32 = vld [vmem:[#allocation7 + $0x164] sm:$0xf]  ;;  %v1196_v33 = vld [vmem:[#allocation7 + $0x168] sm:$0xf0]  ;;  %v1336_v36 = vld [vmem:[#allocation7 + $0x134] sm:$0xf0] }
  0x3a   :  { %648 = vmatpush.bf16.msrb.mxu2 %v1079_v29  ;;  %611 = vmatpush.bf16.msra.mxu3 %v1035_v50  ;;  %v1132_v29 = vld [vmem:[#allocation7 + $0xe8] sm:$0xf0]  ;;  %v1199_v35 = vor.u32 %v1341_v32, %v1196_v33  ;;  %v1299_v37 = vld [vmem:[#allocation7 + $0x14] sm:$0xf]  ;;  %v1028_v38 = vld [vmem:[#allocation7 + $0x18] sm:$0xf0]  ;;  %v1171_v39 = vor.u32 %v1336_v36, %v1170_v34 }
  0x3b   :  { %v1135_v31 = vor.u32 %v1325_v28, %v1132_v29  ;;  %v1031_v40 = vor.u32 %v1299_v37, %v1028_v38  ;;  %v1339_v43 = vld [vmem:[#allocation7 + $0x154] sm:$0xf]  ;;  %v1188_v45 = vld [vmem:[#allocation7 + $0x158] sm:$0xf0]  ;;  %v1334_v48 = vld [vmem:[#allocation7 + $0x124] sm:$0xf0] }
  0x3c   :  { %621 = vmatpush.bf16.msrb.mxu0 %v1131_v41  ;;  %v1323_v41 = vld [vmem:[#allocation7 + $0xd4] sm:$0xf]  ;;  %v1191_v46 = vor.u32 %v1339_v43, %v1188_v45  ;;  %v1297_v49 = vld [vmem:[#allocation7 + $0x4] sm:$0xf]  ;;  %v1180_v57 = vld [vmem:[#allocation7 + $0x148] sm:$0xf0] }
  0x3d   :  { %635 = vmatpush.bf16.msrb.mxu1 %v1195_v47  ;;  %v1162_v47 = vld [vmem:[#allocation7 + $0x120] sm:$0xf]  ;;  %v1321_v52 = vld [vmem:[#allocation7 + $0xc4] sm:$0xf]  ;;  %v1335_v0 = vld [vmem:[#allocation7 + $0x134] sm:$0xf] }
  0x3e   :  { %649 = vmatpush.bf16.msrb.mxu2 %v1071_v42  ;;  %612 = vmatpush.bf16.msra.mxu3 %v1027_v60  ;;  %v1124_v42 = vld [vmem:[#allocation7 + $0xd8] sm:$0xf0]  ;;  %v1163_v50 = vor.u32 %v1334_v48, %v1162_v47  ;;  %v1337_v56 = vld [vmem:[#allocation7 + $0x144] sm:$0xf]  ;;  %v1332_v60 = vld [vmem:[#allocation7 + $0x114] sm:$0xf0] }
  0x3f   :  { %v1127_v44 = vor.u32 %v1323_v41, %v1124_v42  ;;  %v1183_v58 = vor.u32 %v1337_v56, %v1180_v57  ;;  %v1172_v1 = vld [vmem:[#allocation7 + $0x138] sm:$0xf0]  ;;  %v1146_v4 = vld [vmem:[#allocation7 + $0x100] sm:$0xf]  ;;  %v1330_v5 = vld [vmem:[#allocation7 + $0x104] sm:$0xf0] }
  0x40   :  { %622 = vmatpush.bf16.msrb.mxu0 %v1123_v51  ;;  %v1020_v51 = vld [vmem:[#allocation7 + $0x8] sm:$0xf0]  ;;  %v1175_v3 = vor.u32 %v1335_v0, %v1172_v1  ;;  %v1317_v6 = vld [vmem:[#allocation7 + $0xa4] sm:$0xf]  ;;  %v1092_v14 = vld [vmem:[#allocation7 + $0x98] sm:$0xf0] }
  0x41   :  { %636 = vmatpush.bf16.msrb.mxu1 %v1187_v59  ;;  %v1023_v54 = vor.u32 %v1297_v49, %v1020_v51  ;;  %v1154_v59 = vld [vmem:[#allocation7 + $0x110] sm:$0xf]  ;;  %v1164_v10 = vld [vmem:[#allocation7 + $0x128] sm:$0xf0]  ;;  %v1331_v15 = vld [vmem:[#allocation7 + $0x114] sm:$0xf] }
  0x42   :  { %650 = vmatpush.bf16.msrb.mxu2 %v1063_v53  ;;  %613 = vmatpush.bf16.msra.mxu3 %v1019_v7  ;;  %v1116_v53 = vld [vmem:[#allocation7 + $0xc8] sm:$0xf0]  ;;  %v1155_v62 = vor.u32 %v1332_v60, %v1154_v59  ;;  %v1147_v7 = vor.u32 %v1330_v5, %v1146_v4  ;;  %v1156_v17 = vld [vmem:[#allocation7 + $0x118] sm:$0xf0]  ;;  %v1313_v18 = vld [vmem:[#allocation7 + $0x84] sm:$0xf] }
  0x43   :  { %v1119_v55 = vor.u32 %v1321_v52, %v1116_v53  ;;  %v1084_v19 = vld [vmem:[#allocation7 + $0x88] sm:$0xf0]  ;;  %v1159_v20 = vor.u32 %v1331_v15, %v1156_v17  ;;  %v1352_v25 = vld [vmem:[#allocation8 + $0x38] sm:$0xff]  ;;  %v1351_v27 = vld [vmem:[#allocation8 + $0x30] sm:$0xff] }
  0x44   :  { %623 = vmatpush.bf16.msrb.mxu0 %v1115_v61  ;;  %v1319_v61 = vld [vmem:[#allocation7 + $0xb4] sm:$0xf]  ;;  %v1087_v23 = vor.u32 %v1313_v18, %v1084_v19  ;;  %v1350_v42 = vld [vmem:[#allocation8 + $0x28] sm:$0xff]  ;;  %v1349_v43 = vld [vmem:[#allocation8 + $0x20] sm:$0xff] }
  0x45   :  { %637 = vmatpush.bf16.msrb.mxu1 %v1179_v26  ;;  %v1348_v45 = vld [vmem:[#allocation8 + $0x18] sm:$0xff]  ;;  %v1347_v47 = vld [vmem:[#allocation8 + $0x10] sm:$0xff]  ;;  %v1358_v48 = vld [vmem:[#allocation8 + $0x68] sm:$0xff] }
  0x46   :  { %651 = vmatpush.bf16.msrb.mxu2 %v1055_v63  ;;  %662 = vmatpush.bf16.msrb.mxu3 %v1143_v12  ;;  %v1108_v63 = vld [vmem:[#allocation7 + $0xb8] sm:$0xf0]  ;;  %v1346_v49 = vld [vmem:[#allocation8 + $0x8] sm:$0xff]  ;;  %v1345_v51 = vld [vmem:[#allocation8] sm:$0xff] }
  0x47   :  { %v1111_v2 = vor.u32 %v1319_v61, %v1108_v63  ;;  %v1356_v52 = vld [vmem:[#allocation8 + $0x58] sm:$0xff]  ;;  %v1355_v53 = vld [vmem:[#allocation8 + $0x50] sm:$0xff]  ;;  %v1353_v57 = vld [vmem:[#allocation8 + $0x40] sm:$0xff] }
  0x48   :  { %624 = vmatpush.bf16.msrb.mxu0 %v1107_v8  ;;  %v1100_v8 = vld [vmem:[#allocation7 + $0xa8] sm:$0xf0]  ;;  %v360_v56 = vld [vmem:[%s1616_s3] sm:$0x3] }
  0x49   :  { %638 = vmatpush.bf16.msrb.mxu1 %v1171_v39  ;;  %v1103_v11 = vor.u32 %v1317_v6, %v1100_v8 }
  0x4a   :  { %652 = vmatpush.bf16.msrb.mxu2 %v1047_v9  ;;  %663 = vmatpush.bf16.msrb.mxu3 %v1135_v31  ;;  %v1333_v9 = vld [vmem:[#allocation7 + $0x124] sm:$0xf] }
  0x4b   :  { %v1167_v12 = vor.u32 %v1333_v9, %v1164_v10 }
  0x4c   :  { %625 = vmatpush.bf16.msrb.mxu0 %v1099_v13  ;;  %v1315_v13 = vld [vmem:[#allocation7 + $0x94] sm:$0xf] }
  0x4d   :  { %639 = vmatpush.bf16.msrb.mxu1 %v1163_v50  ;;  %v1357_v50 = vld [vmem:[#allocation8 + $0x60] sm:$0xff] }
  0x4e   :  { %653 = vmatpush.bf16.msrb.mxu2 %v1039_v30  ;;  %664 = vmatpush.bf16.msrb.mxu3 %v1127_v44  ;;  %v1360_v44 = vld [vmem:[#allocation8 + $0x78] sm:$0xff] }
  0x50   :  { %626 = vmatpush.bf16.msrb.mxu0 %v1091_v16  ;;  %v1095_v16 = vor.u32 %v1315_v13, %v1092_v14 }
  0x51   :  { %640 = vmatpush.bf16.msrb.mxu1 %v1155_v62 }
  0x52   :  { %654 = vmatpush.bf16.msrb.mxu2 %v1031_v40  ;;  %665 = vmatpush.bf16.msrb.mxu3 %v1119_v55 }
  0x54   :  { %627 = vmatpush.bf16.msrb.mxu0 %v1083_v21  ;;  %v1329_v21 = vld [vmem:[#allocation7 + $0x104] sm:$0xf] }
  0x55   :  { %641 = vmatpush.bf16.msrb.mxu1 %v1147_v7  ;;  %v363_v7 = vperm.slane %v360_v56, 1 }
  0x56   :  { %655 = vmatpush.bf16.msrb.mxu2 %v1023_v54  ;;  %666 = vmatpush.bf16.msrb.mxu3 %v1111_v2  ;;  %v1354_v54 = vld [vmem:[#allocation8 + $0x48] sm:$0xff] }
  0x58   :  { %676 = vmatpush.bf16.msra.mxu0 %v1207_v22  ;;  %v1148_v22 = vld [vmem:[#allocation7 + $0x108] sm:$0xf0] }
  0x59   :  { %v1151_v24 = vor.u32 %v1329_v21, %v1148_v22  ;;  %828 = vmatpush.bf16.msra.mxu1 %v1352_v25 }
  0x5a   :  { %667 = vmatpush.bf16.msrb.mxu3 %v1103_v11  ;;  %842 = vmatpush.bf16.msra.mxu2 %v1360_v44 }
  0x5c   :  { %677 = vmatpush.bf16.msra.mxu0 %v1199_v35 }
  0x5d   :  { %829 = vmatpush.bf16.msra.mxu1 %v1351_v27 }
  0x5e   :  { %668 = vmatpush.bf16.msrb.mxu3 %v1095_v16 }
  0x60   :  { %678 = vmatpush.bf16.msra.mxu0 %v1191_v46  ;;  %v1359_v46 = vld [vmem:[#allocation8 + $0x70] sm:$0xff] }
  0x61   :  { %830 = vmatpush.bf16.msra.mxu1 %v1350_v42  ;;  %843 = vmatpush.bf16.msra.mxu2 %v1359_v46 }
  0x62   :  { %669 = vmatpush.bf16.msrb.mxu3 %v1087_v23 }
  0x64   :  { %679 = vmatpush.bf16.msra.mxu0 %v1183_v58  ;;  %v362_v58 = vperm.slane %v360_v56, 0 }
  0x65   :  { %831 = vmatpush.bf16.msra.mxu1 %v1349_v43  ;;  %844 = vmatpush.bf16.msra.mxu2 %v1358_v48 }
  0x68   :  { %680 = vmatpush.bf16.msra.mxu0 %v1175_v3 }
  0x69   :  { %832 = vmatpush.bf16.msra.mxu1 %v1348_v45  ;;  %845 = vmatpush.bf16.msra.mxu2 %v1357_v50  ;;  %v884_v45 = vld [vmem:[%s1620_s7] sm:$0x1]  ;;  %s1526_s7 = smov [#allocation10]  }
  0x6a   :  { %vm885_vm0 = vcmp.ne.f32.partialorder %v884_v45, 0.0  ;;  %s899_s10 = sshll.u32 %s1526_s7, 4  ;;  %s900_s10 = int_to_ptr.vmem [resolvable:$true] %s899_s10 }
  0x6c   :  { %681 = vmatpush.bf16.msra.mxu0 %v1167_v12 }
  0x6d   :  { %833 = vmatpush.bf16.msra.mxu1 %v1347_v47  ;;  %846 = vmatpush.bf16.msra.mxu2 %v1356_v52  ;;  %v1525_v47 = vmov 0  }
  0x6e   :  { %v888_v48 = vsel %vm885_vm0, 1, %v1525_v47 }
  0x6f   :  { %v889_v50 = vperm.slane %v888_v48, 0 }
  0x70   :  { %682 = vmatpush.bf16.msra.mxu0 %v1159_v20 }
  0x71   :  { %834 = vmatpush.bf16.msra.mxu1 %v1346_v49  ;;  %847 = vmatpush.bf16.msra.mxu2 %v1355_v53  ;;  %vm1599_vm1 = vcmp.eq.s32.totalorder %v889_v50, 1 }
  0x74   :  { %683 = vmatpush.bf16.msra.mxu0 %v1151_v24 }
  0x75   :  { %835 = vmatpush.bf16.msra.mxu1 %v1345_v51  ;;  %848 = vmatpush.bf16.msra.mxu2 %v1354_v54 }
  0x79   :  { %849 = vmatpush.bf16.msra.mxu2 %v1353_v57 }
  0xb4   :  { %v270_v26 = vpop.f32.mrf.mxu0 }
  0xb5   :  { %v284_v28 = vpop.f32.mrf.mxu1  ;;  %v303_v32 = vmax.f32 %v270_v26, 0.0  ;;  %v1373_v26 = vld [vmem:[%s1618_s5] ss:$0 sm:$0xff] }
  0xb6   :  { %v304_v30 = vmax.f32 %v284_v28, 0.0  ;;  %v1374_v28 = vld [vmem:[%s1619_s6] ss:$0 sm:$0xff] }
  0xbc   :  { %v298_v29 = vpop.f32.mrf.mxu2  ;;  %v272_v31 = vpop.f32.mrf.mxu0 }
  0xbd   :  { %v306_v33 = vmax.f32 %v272_v31, 0.0  ;;  %v286_v34 = vpop.f32.mrf.mxu1  ;;  %v305_v38 = vmax.f32 %v298_v29, 0.0 }
  0xbe   :  { %v307_v35 = vmax.f32 %v286_v34, 0.0 }
  0xbf   :  { %v309_v36 = vpack.c.bf16 %v306_v33, %v303_v32 }
  0xc0   :  { %v310_v37 = vpack.c.bf16 %v307_v35, %v304_v30 }
  0xc1   :  { %614 = vmatmul.bf16.vlgmr.msra.gmra.mxu3 %v309_v36  ;;  %656 = vmatmul.bf16.vlgmr.msrb.gmra.mxu2 %v309_v36 }
  0xc2   :  { %628 = vmatmul.bf16.vlgmr.msrb.gmra.mxu0 %v310_v37 }
  0xc4   :  { %v300_v39 = vpop.f32.mrf.mxu2 }
  0xc5   :  { %v308_v40 = vmax.f32 %v300_v39, 0.0 }
  0xc7   :  { %v311_v41 = vpack.c.bf16 %v308_v40, %v305_v38 }
  0xc9   :  { %642 = vmatmul.bf16.vlgmr.msrb.gmra.mxu1 %v311_v41 }
  0xd1   :  { %670 = vmatmul.bf16.vlgmr.msrb.gmra.mxu3 %v310_v37 }
  0xd2   :  { %684 = vmatmul.bf16.vlgmr.msra.gmra.mxu0 %v311_v41 }
 0x13f   :  { %v629_v55 = vpop.f32.mrf.mxu0 }
 0x144   :  { %v615_v59 = vpop.f32.mrf.mxu3  ;;  %v657_v2 = vpop.f32.mrf.mxu2 }
 0x145   :  { %v616_v61 = vadd.f32 %v615_v59, %v362_v58  ;;  %v658_v13 = vadd.f32 %v657_v2, %v363_v7 }
 0x146   :  { %v643_v60 = vpop.f32.mrf.mxu1 }
 0x147   :  { %v631_v62 = vpop.f32.mrf.mxu0  ;;  %v630_v63 = vadd.f32 %v629_v55, %v616_v61 }
 0x149   :  { %v644_v3 = vadd.f32 %v643_v60, %v630_v63 }
 0x14b   :  { %v690_v8 = vmax.f32 %v644_v3, 0.0 }
 0x14c   :  { %v617_v0 = vpop.f32.mrf.mxu3  ;;  %v659_v14 = vpop.f32.mrf.mxu2 }
 0x14d   :  { %v618_v1 = vadd.f32 %v617_v0, %v362_v58  ;;  %v660_v16 = vadd.f32 %v659_v14, %v363_v7 }
 0x14e   :  { %v645_v5 = vpop.f32.mrf.mxu1 }
 0x14f   :  { %v632_v4 = vadd.f32 %v631_v62, %v618_v1  ;;  %v685_v10 = vpop.f32.mrf.mxu0 }
 0x151   :  { %v646_v6 = vadd.f32 %v645_v5, %v632_v4 }
 0x153   :  { %v692_v9 = vmax.f32 %v646_v6, 0.0 }
 0x154   :  { %v671_v11 = vpop.f32.mrf.mxu3 }
 0x155   :  { %v694_v12 = vpack.c.bf16 %v692_v9, %v690_v8  ;;  %v672_v15 = vadd.f32 %v671_v11, %v658_v13 }
 0x157   :  { %836 = vmatmul.bf16.vlgmr.msra.gmra.mxu1 %v694_v12  ;;  %v686_v18 = vadd.f32 %v685_v10, %v672_v15  ;;  %v687_v20 = vpop.f32.mrf.mxu0 }
 0x159   :  { %v691_v22 = vmax.f32 %v686_v18, 0.0 }
 0x15c   :  { %v673_v17 = vpop.f32.mrf.mxu3 }
 0x15d   :  { %v674_v19 = vadd.f32 %v673_v17, %v660_v16 }
 0x15f   :  { %v688_v21 = vadd.f32 %v687_v20, %v674_v19 }
 0x161   :  { %v693_v23 = vmax.f32 %v688_v21, 0.0 }
 0x163   :  { %v695_v24 = vpack.c.bf16 %v693_v23, %v691_v22 }
 0x165   :  { %850 = vmatmul.bf16.vlgmr.msra.gmra.mxu2 %v695_v24 }
 0x1d4   :  { %v837_v25 = vpop.f32.mrf.mxu1 }
 0x1d5   :  { %v838_v27 = vadd.f32 %v1373_v26, %v837_v25 }
 0x1dc   :  { %v839_v32 = vpop.f32.mrf.mxu1 }
 0x1dd   :  { %v840_v33 = vadd.f32 %v1373_v26, %v839_v32 }
 0x1e8   :  { %v851_v29 = vpop.f32.mrf.mxu2 }
 0x1e9   :  { %v852_v30 = vadd.f32 %v851_v29, %v838_v27 }
 0x1eb   :  { %v860_v31 = vadd.f32 %v1374_v28, %v852_v30 }
 0x1ed   :  { %862 = vmax.xlane.f32.xlu0 %v860_v31 }
 0x1f0   :  { %v853_v34 = vpop.f32.mrf.mxu2 }
 0x1f1   :  { %v854_v35 = vadd.f32 %v853_v34, %v840_v33 }
 0x1f3   :  { %v861_v36 = vadd.f32 %v1374_v28, %v854_v35 }
 0x1f5   :  { %864 = vmax.xlane.f32.xlu0 %v861_v36 }
 0x260   :  { %v863_v37 = vpop.xlane.xlu0 %862 }
 0x261   :  { %v866_v38 = vsub.f32 %v860_v31, %v863_v37 }
 0x263   :  { %v868_v39 = vmul.f32 1.442695, %v866_v38 }
 0x265   :  { %1375 = vpow2.f32 %v868_v39 }
 0x268   :  { %v865_v40 = vpop.xlane.xlu0 %864 }
 0x269   :  { %v867_v41 = vsub.f32 %v861_v36, %v865_v40 }
 0x26b   :  { %v1376_v42 = vpop.eup %1375  ;;  %v870_v43 = vmul.f32 1.442695, %v867_v41 }
 0x26c   :  { %872 = vadd.xlane.f32.xlu1 %v1376_v42 }
 0x26d   :  { %1377 = vpow2.f32 %v870_v43 }
 0x273   :  { %v1378_v44 = vpop.eup %1377 }
 0x274   :  { %874 = vadd.xlane.f32.xlu1 %v1378_v44 }
 0x2df   :  { %v873_v46 = vpop.xlane.xlu1 %872 }
 0x2e0   :  { %1379 = vlog2.f32 %v873_v46 }
 0x2e1   :  { %1381 = vtanh.f32 %v852_v30 }
 0x2e6   :  { %v1380_v49 = vpop.eup %1379 }
 0x2e7   :  { %v877_v51 = vmul.f32 0.6931472, %v1380_v49  ;;  %v875_v52 = vpop.xlane.xlu1 %874  ;;  %v1382_v56 = vpop.eup %1381 }
 0x2e8   :  { %1383 = vlog2.f32 %v875_v52 }
 0x2e9   :  { %v880_v53 = vadd.f32 %v877_v51, %v863_v37  ;;  %1385 = vtanh.f32 %v854_v35 }
 0x2eb   :  { %v882_v55 = vsub.f32 %v852_v30, %v880_v53 }
 0x2ed   :  { %v891_v57 = vsel %vm1599_vm1, %v1382_v56, %v882_v55 }
 0x2ee   :  { %v1384_v58 = vpop.eup %1383  ;;  %893 = vst [vmem:[#allocation10] sm:$0xff] %v891_v57 }
 0x2ef   :  { %v879_v59 = vmul.f32 0.6931472, %v1384_v58  ;;  %v1386_v62 = vpop.eup %1385 }
 0x2f1   :  { %v881_v60 = vadd.f32 %v879_v59, %v865_v40 }
 0x2f3   :  { %v883_v61 = vsub.f32 %v854_v35, %v881_v60 }
 0x2f5   :  { %v892_v63 = vsel %vm1599_vm1, %v1386_v62, %v883_v61 }
 0x2f6   :  { %894 = vst [vmem:[#allocation10 + $0x8] sm:$0xff] %v892_v63 }
 0x2f7   :  { %907 = dma.vmem_to_hbm [thread:$0]  %s900_s10, 256, %s902_s13, [#allocation4], %s1522_s25, %s1522_s25, %s1523_s26  }
 0x2f8   :  { %1513 = dma.done.wait [#allocation4], 256  }
 0x2f9   :  { %1514 = vsyncadd [#allocation4], 4294967040 }
 0x2fa   :  { %912 = vsyncpa [#allocation3], 1 }
 0x2fb   :  { %913 = vsyncpa [#allocation6], 1 }
 0x2fc   :  { %914 = vsyncpa [#allocation9], 1 }
 0x2fd   :  { %915 = vsyncpa [#allocation4], 1 }

</bundles_post_ra>
